<compile_context>
chip_gen: v7x
topology: tpu7x:2x2x1
jax: 0.10.0
libtpu: 0.0.40
codegen_flags: <defaults>
</compile_context>

<pallas_src>
import jax
import jax.numpy as jnp
from jax.experimental import pallas as pl
from jax.experimental.pallas import tpu as pltpu


def post_attn_kernel(x_ref, bias_ref, w_ref, out_ref, attn_ref):
    # x_ref:    (TB, N, H)  node features for TB batch elements
    # bias_ref: (TB, N, 1)  mask[b,n] * <x[b,0,:], w_root>  (precomputed)
    # w_ref:    (1, H)      weight acting on x (first half of the Linear)
    # out_ref:  (TB, 1, H)  attention-pooled features (lane-dense in H)
    # attn_ref: (TB, N, 1)  softmax attention weights
    xb = x_ref[...]                                     # (TB, N, H)
    bias = bias_ref[...]                                # (TB, N, 1)
    wx = w_ref[...].reshape(1, 1, -1)                   # (1, 1, H)

    # logits[b,n] = <x[b,n,:], wx> + mask[b,n] * <x[b,0,:], wr>
    # VPU multiply + lane reduce; the root term arrives precomputed as bias.
    logits = jnp.sum(xb * wx, axis=-1, keepdims=True) + bias        # (TB, N, 1)

    # masked_fill_(attn == 0, -1e20)   (faithful to the PyTorch module)
    logits = jnp.where(logits == 0.0, jnp.float32(-1e20), logits)

    # softmax over the N axis (axis=1), all f32.
    m = jnp.max(logits, axis=1, keepdims=True)                      # (TB, 1, 1)
    p = jnp.exp(logits - m)                                         # (TB, N, 1)
    denom = jnp.sum(p, axis=1, keepdims=True)                       # (TB, 1, 1)
    attn = p / denom                                                # exact divide

    attn_ref[...] = attn.astype(attn_ref.dtype)
    # out[b,h] = sum_n attn[b,n] * x[b,n,h]  (sublane reduce, lane-dense result)
    out_ref[...] = jnp.sum(attn * xb, axis=1, keepdims=True).astype(out_ref.dtype)


def _round_up(x, m):
    return ((x + m - 1) // m) * m


def _padded_block_bytes(shape, itemsize=4):
    """VMEM bytes of one block after (8-sublane, 128-lane) layout padding."""
    if len(shape) == 1:
        return _round_up(shape[0] * itemsize, 512)
    *lead, s, l = shape
    nbytes = _round_up(s, 8) * _round_up(l, 128) * itemsize
    for d in lead:
        nbytes *= d
    return nbytes


def _tpu_vmem_config():
    """(double-buffered block budget, vmem_limit_bytes, min grid steps) per generation."""
    kind = ""
    try:
        kind = jax.devices()[0].device_kind.lower()
    except Exception:
        pass
    if "v7" in kind:                                   # 64 MiB physical VMEM, 2 TCs
        return 40 << 20, 48 << 20, 2
    if "v6" in kind:                                   # 128 MiB physical, 1 TC
        return 80 << 20, 100 << 20, 1
    if "v5 lite" in kind or "v5e" in kind or "v5lite" in kind:
        return 64 << 20, 96 << 20, 1                   # 128 MiB physical, 16 MiB scoped default
    if "v4" in kind or "v5" in kind:                   # v4 / v5p megacore: 2 TCs
        return 64 << 20, 96 << 20, 2
    return 32 << 20, 48 << 20, 2                       # unknown: v7x-safe defaults


def _pick_batch_tile(B, N, H, *, budget_bytes, min_grid_steps):
    """Largest batch tile whose double-buffered, layout-padded blocks fit the budget."""
    per_batch = (
        _padded_block_bytes((1, N, H))     # x block
        + _padded_block_bytes((1, N, 1))   # root-bias block
        + _padded_block_bytes((1, 1, H))   # pooled-output block
        + _padded_block_bytes((1, N, 1))   # attn block
    ) * 2                                  # double buffering
    resident = 2 * _padded_block_bytes((1, H))   # weight row (constant index_map)
    cap = max(1, (budget_bytes - resident) // per_batch)
    tb = min(B, cap)
    # Keep >= min_grid_steps grid iterations so dual-TC parts shard the axis.
    tb = min(tb, max(1, pl.cdiv(B, min_grid_steps)))
    if tb >= 8:                                  # sublane-align large tiles
        tb = (tb // 8) * 8
    return max(tb, 1)


def post_attn(x, mask_nonzero, weight):
    """x: (B, N, H) float32; mask_nonzero: (batch_idx, row_idx) int arrays;
    weight: (1, 2H) float32 (nn.Linear(2*H, 1, bias=False).weight)."""
    B, N, H = x.shape
    batch_idx, row_idx = mask_nonzero

    x = x.astype(jnp.float32)
    w = weight.reshape(1, 2 * H).astype(jnp.float32)
    wx = w[:, :H]                                      # acts on x        (1, H)
    wr = w[:, H:]                                      # acts on the root (1, H)

    # Plain-JAX glue: dense {0,1} scatter mask fused with the root logit.
    mask = jnp.zeros((B, N), jnp.float32).at[batch_idx, row_idx].set(1.0)
    root_logit = jnp.sum(x[:, 0, :] * wr, axis=-1)     # (B,)
    bias = (mask * root_logit[:, None]).reshape(B, N, 1)

    budget, vmem_limit, min_steps = _tpu_vmem_config()
    tb = _pick_batch_tile(B, N, H, budget_bytes=budget, min_grid_steps=min_steps)
    b_pad = _round_up(B, tb)
    if b_pad != B:                                     # pad B instead of shrinking tb
        pad = b_pad - B
        x_k = jnp.pad(x, ((0, pad), (0, 0), (0, 0)))
        bias_k = jnp.pad(bias, ((0, pad), (0, 0), (0, 0)))
    else:
        x_k, bias_k = x, bias
    grid = (b_pad // tb,)

    out, attn = pl.pallas_call(
        post_attn_kernel,
        out_shape=(
            jax.ShapeDtypeStruct((b_pad, 1, H), jnp.float32),
            jax.ShapeDtypeStruct((b_pad, N, 1), jnp.float32),
        ),
        grid_spec=pltpu.PrefetchScalarGridSpec(
            num_scalar_prefetch=0,
            grid=grid,
            in_specs=[
                pl.BlockSpec((tb, N, H), lambda b: (b, 0, 0)),
                pl.BlockSpec((tb, N, 1), lambda b: (b, 0, 0)),
                pl.BlockSpec((1, H), lambda b: (0, 0)),        # resident weight row
            ],
            out_specs=[
                pl.BlockSpec((tb, 1, H), lambda b: (b, 0, 0)),
                pl.BlockSpec((tb, N, 1), lambda b: (b, 0, 0)),
            ],
        ),
        compiler_params=pltpu.CompilerParams(
            dimension_semantics=("parallel",),
            vmem_limit_bytes=vmem_limit),
    )(x_k, bias_k, wx)

    pooled = out[:B].reshape(B, H)
    if B == 1:
        pooled = pooled.reshape(H)   # torch .squeeze() drops the batch dim for B == 1
    return pooled, attn[:B]


def post_attn_ref(x, mask_nonzero, weight):
    """Pure-JAX reference mirroring the PyTorch forward."""
    B, N, H = x.shape
    batch_idx, row_idx = mask_nonzero
    root = jnp.zeros_like(x).at[batch_idx, row_idx, :].set(x[batch_idx, 0, :])
    x_plus = jnp.concatenate([x, root], axis=-1)                # (B, N, 2H)
    attn = x_plus @ weight.T                                    # (B, N, 1)
    attn = jnp.where(attn == 0.0, -1e20, attn)
    attn = jax.nn.softmax(attn, axis=1)
    out = jnp.einsum("bhn,bno->bho", x.transpose(0, 2, 1), attn).reshape(B, H)
    return out, attn


if __name__ == "__main__":
    B, N, H = 2, 8, 32  # h_in = 32

    key = jax.random.PRNGKey(0)
    kx, kw = jax.random.split(key)
    x = jax.random.normal(kx, (B, N, H), dtype=jnp.float32)

    # Deterministic Linear(2H, 1, bias=False) weight (Kaiming-uniform style bound).
    bound = 1.0 / (2.0 * H) ** 0.5
    weight = jax.random.uniform(kw, (1, 2 * H), jnp.float32, -bound, bound)

    # mask_nonzero: (batch indices, row indices) of the nonzero mask entries.
    batch_idx = jnp.array([0, 0, 0, 1, 1, 1, 1], dtype=jnp.int32)
    row_idx = jnp.array([1, 2, 3, 1, 2, 4, 6], dtype=jnp.int32)

    out, attn = post_attn(x, (batch_idx, row_idx), weight)
    jax.block_until_ready((out, attn))

    out_r, attn_r = post_attn_ref(x, (batch_idx, row_idx), weight)
    assert out.shape == (B, H) and attn.shape == (B, N, 1)
    assert jnp.allclose(out, out_r, atol=1e-4, rtol=1e-4)
    assert jnp.allclose(attn, attn_r, atol=1e-4, rtol=1e-4)

    print("KERNEL_OK")
</pallas_src>

<mosaic_0001>
module attributes {stable_mosaic.version = 11 : i64} {
  func.func @post_attn_kernel(%arg0: i32, %arg1: memref<1x8x32xf32, #tpu.memory_space<vmem>>, %arg2: memref<1x8x1xf32, #tpu.memory_space<vmem>>, %arg3: memref<1x32xf32, #tpu.memory_space<vmem>>, %arg4: memref<1x1x32xf32, #tpu.memory_space<vmem>>, %arg5: memref<1x8x1xf32, #tpu.memory_space<vmem>>) attributes {dimension_semantics = [#tpu.dimension_semantics<parallel>], iteration_bounds = array<i64: 2>, scalar_prefetch = 0 : i64, scratch_operands = 0 : i64, tpu.core_type = #tpu.core_type<tc>, window_params = [{transform_indices = @transform_0, window_bounds = array<i64: 1, 8, 32>}, {transform_indices = @transform_1, window_bounds = array<i64: 1, 8, 1>}, {pipeline_mode = #tpu.pipeline_mode<synchronous>, transform_indices = @transform_2, window_bounds = array<i64: 1, 32>}, {transform_indices = @transform_3, window_bounds = array<i64: 1, 1, 32>}, {transform_indices = @transform_4, window_bounds = array<i64: 1, 8, 1>}]} {
    %c0 = arith.constant 0 : index
    %c0_0 = arith.constant 0 : index
    %c0_1 = arith.constant 0 : index
    %0 = vector.load %arg1[%c0, %c0_0, %c0_1] : memref<1x8x32xf32, #tpu.memory_space<vmem>>, vector<1x8x32xf32>
    %c0_2 = arith.constant 0 : index
    %c0_3 = arith.constant 0 : index
    %c0_4 = arith.constant 0 : index
    %1 = vector.load %arg2[%c0_2, %c0_3, %c0_4] : memref<1x8x1xf32, #tpu.memory_space<vmem>>, vector<1x8x1xf32>
    %c0_5 = arith.constant 0 : index
    %c0_6 = arith.constant 0 : index
    %2 = vector.load %arg3[%c0_5, %c0_6] : memref<1x32xf32, #tpu.memory_space<vmem>>, vector<1x32xf32>
    %3 = vector.shape_cast %2 : vector<1x32xf32> to vector<1x1x32xf32>
    %4 = vector.broadcast %3 : vector<1x1x32xf32> to vector<1x8x32xf32>
    %5 = arith.mulf %0, %4 : vector<1x8x32xf32>
    %cst = arith.constant dense<0.000000e+00> : vector<1x8xf32>
    %6 = vector.multi_reduction <add>, %5, %cst [2] : vector<1x8x32xf32> to vector<1x8xf32>
    %7 = vector.shape_cast %6 : vector<1x8xf32> to vector<1x8x1xf32>
    %8 = arith.addf %7, %1 : vector<1x8x1xf32>
    %cst_7 = arith.constant 0.000000e+00 : f32
    %9 = vector.broadcast %cst_7 : f32 to vector<1x8x1xf32>
    %10 = arith.cmpf oeq, %8, %9 : vector<1x8x1xf32>
    %cst_8 = arith.constant -1.000000e+20 : f32
    %11 = vector.broadcast %cst_8 : f32 to vector<1x8x1xf32>
    %12 = arith.select %10, %11, %8 : vector<1x8x1xi1>, vector<1x8x1xf32>
    %cst_9 = arith.constant dense<0xFF800000> : vector<1x1xf32>
    %13 = vector.multi_reduction <maximumf>, %12, %cst_9 [1] : vector<1x8x1xf32> to vector<1x1xf32>
    %14 = vector.shape_cast %13 : vector<1x1xf32> to vector<1x1x1xf32>
    %15 = vector.broadcast %14 : vector<1x1x1xf32> to vector<1x8x1xf32>
    %16 = arith.subf %12, %15 : vector<1x8x1xf32>
    %17 = math.exp %16 : vector<1x8x1xf32>
    %cst_10 = arith.constant dense<0.000000e+00> : vector<1x1xf32>
    %18 = vector.multi_reduction <add>, %17, %cst_10 [1] : vector<1x8x1xf32> to vector<1x1xf32>
    %19 = vector.shape_cast %18 : vector<1x1xf32> to vector<1x1x1xf32>
    %20 = vector.broadcast %19 : vector<1x1x1xf32> to vector<1x8x1xf32>
    %21 = arith.divf %17, %20 : vector<1x8x1xf32>
    %c0_11 = arith.constant 0 : index
    %c0_12 = arith.constant 0 : index
    %c0_13 = arith.constant 0 : index
    %22 = vector.load %arg5[%c0_11, %c0_12, %c0_13] : memref<1x8x1xf32, #tpu.memory_space<vmem>>, vector<1x8x1xf32>
    tpu.vector_store %arg5[%c0_11, %c0_12, %c0_13], %21 {strides = array<i32>} : memref<1x8x1xf32, #tpu.memory_space<vmem>>, vector<1x8x1xf32>,
    %23 = vector.broadcast %21 : vector<1x8x1xf32> to vector<1x8x32xf32>
    %24 = arith.mulf %23, %0 : vector<1x8x32xf32>
    %cst_14 = arith.constant dense<0.000000e+00> : vector<1x32xf32>
    %25 = vector.multi_reduction <add>, %24, %cst_14 [1] : vector<1x8x32xf32> to vector<1x32xf32>
    %26 = vector.shape_cast %25 : vector<1x32xf32> to vector<1x1x32xf32>
    %c0_15 = arith.constant 0 : index
    %c0_16 = arith.constant 0 : index
    %c0_17 = arith.constant 0 : index
    %27 = vector.load %arg4[%c0_15, %c0_16, %c0_17] : memref<1x1x32xf32, #tpu.memory_space<vmem>>, vector<1x1x32xf32>
    tpu.vector_store %arg4[%c0_15, %c0_16, %c0_17], %26 {strides = array<i32>} : memref<1x1x32xf32, #tpu.memory_space<vmem>>, vector<1x1x32xf32>,
    return
  }
  func.func @transform_0(%arg0: i32) -> (i32, i32, i32) {
    %c0_i32 = arith.constant 0 : i32
    %c0_i32_0 = arith.constant 0 : i32
    %c0_i32_1 = arith.constant 0 : i32
    return %arg0, %c0_i32, %c0_i32_0 : i32, i32, i32
  }
  func.func @transform_1(%arg0: i32) -> (i32, i32, i32) {
    %c0_i32 = arith.constant 0 : i32
    %c0_i32_0 = arith.constant 0 : i32
    %c0_i32_1 = arith.constant 0 : i32
    return %arg0, %c0_i32, %c0_i32_0 : i32, i32, i32
  }
  func.func @transform_2(%arg0: i32) -> (i32, i32) {
    %c0_i32 = arith.constant 0 : i32
    %c0_i32_0 = arith.constant 0 : i32
    %c0_i32_1 = arith.constant 0 : i32
    return %c0_i32, %c0_i32_0 : i32, i32
  }
  func.func @transform_3(%arg0: i32) -> (i32, i32, i32) {
    %c0_i32 = arith.constant 0 : i32
    %c0_i32_0 = arith.constant 0 : i32
    %c0_i32_1 = arith.constant 0 : i32
    return %arg0, %c0_i32, %c0_i32_0 : i32, i32, i32
  }
  func.func @transform_4(%arg0: i32) -> (i32, i32, i32) {
    %c0_i32 = arith.constant 0 : i32
    %c0_i32_0 = arith.constant 0 : i32
    %c0_i32_1 = arith.constant 0 : i32
    return %arg0, %c0_i32, %c0_i32_0 : i32, i32, i32
  }
}

</mosaic_0001>

<bundles_post_ra>
// kernel: tpu_custom_call.1
= control target key start
LH: loop header
LB: loop body
LE: loop exit
PB: predicated region body
PF: predicated region fallthrough
CT: control target
= control target key end

     0   :  { %10 = vsyncpa [#allocation3], 0  ;;  %s650_s0 = inlined_call_operand.vmem [shape: f32[2,8,32], index: 0, kind: input, shape index: {}]   ;;  %s651_s1 = inlined_call_operand.vmem [shape: f32[2,8,1], index: 1, kind: input, shape index: {}]   ;;  %s652_s2 = inlined_call_operand.vmem [shape: f32[1,32], index: 2, kind: input, shape index: {}]   ;;  %s653_s3 = inlined_call_operand.hbm [shape: f32[2,1,32], index: 3, kind: output, shape index: {0}]   ;;  %s654_s4 = inlined_call_operand.vmem [shape: f32[2,8,1], index: 4, kind: output, shape index: {1}]  }
   0x1   :  { %12 = vsyncpa [#allocation3 + $0x1], 0  ;;  %s531_s15 = smov 0   ;;  %s533_s16 = smov 0  }
   0x2   :  { %s535_s17 = smov 0   ;;  %s537_s18 = smov 0  }
   0x3 LB: > { %s552_s19 = sadd.s32 4294967295, %s502_s18   ;;  %s384_s20 = sadd.s32 4294967294, %s502_s18   ;;  %s502_s18 = sphi %s537_s18, %s660_s18   ;;  %s498_s17 = sphi %s535_s17, %s659_s17   ;;  %s494_s16 = sphi %s533_s16, %s658_s16   ;;  %s490_s15 = sphi %s531_s15, %s657_s15  }
   0x4   : > { %s556_s21 = sadd.s32 1, %s502_s18   ;;  %s98_s22 = sadd.s32 1, %s498_s17 }
   0x5   : > { %s95_s23 = ssub.s32 %s502_s18, %s556_s21  ;;  %p108_p0 = scmp.ne.s32.totalorder %s498_s17, %s494_s16 }
   0x6   : > { %p96_p1 = scmp.eq.s32.totalorder %s95_s23, 0  ;;  %p109_p2 = scmp.eq.s32.totalorder %s552_s19, 1 }
   0x7   : > { %p114_p3 = scmp.ne.s32.totalorder %s494_s16, %s490_s15  ;;  %p115_p4 = scmp.eq.s32.totalorder %s384_s20, 1 }
   0x8   : > { %s567_s24 = scalar_select %p96_p1, %s498_s17, %s98_s22  }
   0x9   : > { %p569_p5 = por %p109_p2, %p108_p0  ;;  %p573_p6 = por %p115_p4, %p114_p3 }
   0xa   : > { %p387_p7 = scmp.ge.s32.totalorder %s502_s18, 1  ;;  %p176_p8 = scmp.lt.s32.totalorder %s502_s18, 3 }
   0xc   : > { %p177_p9 = pnand %p387_p7, %p176_p8 }
   0xd   : > { %p208_p10 = scmp.lt.s32.totalorder (!%p177_p9), %s552_s19, 1  ;;  %v391_v0 = vld [vmem:[%s652_s2] ss:$0 sm:$0xff] (!%p177_p9)  ;;  %vm230_vm0 = vcmask (!%p177_p9), 261120   ;;  %v504_v4 = vmov (!%p177_p9), 0   ;;  %vm237_vm1 = vcmask (!%p177_p9), 7168  }
   0xe   : > { %180 = sbr.rel (%p177_p9) target bundleno = 386 (0x182), region = 32  ;;  %435 = vset.pattern.permute.xlu0 (!%p177_p9), %v504_v4  ;;  %s200_s14 = sand.u32 (!%p177_p9), 1, %s494_s16   ;;  %vm271_vm3 = vcmask (!%p177_p9), 253952  }
   0xf   : > { %s392_s20 = sshll.u32 (!%p177_p9), %s552_s19, 4  ;;  %s201_s22 = scalar_lea.vmem (!%p177_p9), [#allocation2], %s200_s14 }
  0x10   : > { %s290_s23 = sshll.u32 (!%p177_p9), %s201_s22, 4  ;;  %s608_s29 = scalar_lea.hbm (!%p177_p9), %s653_s3, %s392_s20  ;;  %s610_s23 = int_to_ptr.vmem [resolvable:$true] %s290_s23 }
  0x11   : > { %s274_s30 = scalar_lea.sflag (!%p177_p9), [#allocation3], %s200_s14  ;;  %s440_s5 = scalar_lea.vmem (!%p177_p9), %s610_s23, 16 }
  0x12   : > { %p441_p11 = scmp.ne.s32.totalorder (!%p177_p9), %s610_s23, %s440_s5 }
  0x14   : > { %p442_p12 = pnand (!%p177_p9), %p441_p11, %p569_p5 }
  0x15   : > { %s209_s27 = scalar_select %p208_p10, %s552_s19, 1 }
  0x16   : > { %p443_p13 = pneg %p442_p12  ;;  %s505_s19 = smov [#allocation2]  }
  0x17   : > { %s581_s28 = sshll.u32 %s209_s27, 3  ;;  %s444_s6 = sshll.u32 %s505_s19, 4  ;;  %s445_s6 = int_to_ptr.vmem [resolvable:$false] %s444_s6 }
  0x18   : > { %s211_s7 = scalar_lea.vmem %s650_s0, %s581_s28  ;;  %s215_s10 = scalar_lea.vmem %s651_s1, %s581_s28 }
  0x19   : > { %v220_v1 = vld [vmem:[%s211_s7] sm:$0xff]  ;;  %s219_s13 = scalar_lea.vmem %s654_s4, %s581_s28  ;;  %s446_s7 = scalar_lea.vmem %s445_s6, 32 }
  0x1a   : > { %v229_v2 = vmul.f32 %v391_v0, %v220_v1  ;;  %v221_v5 = vld [vmem:[%s215_s10] sm:$0xff]  ;;  %p447_p0 = scmp.lt.s32.totalorder %s610_s23, %s445_s6  ;;  %p448_p1 = scmp.lt.s32.totalorder %s446_s7, %s440_s5 }
  0x1c   : > { %v231_v3 = vsel %vm230_vm0, %v229_v2, 0.0  ;;  %p449_p2 = por %p448_p1, %p447_p0 }
  0x1d   : > { %232 = vadd.xlane.f32.xlu0 %v231_v3 }
  0x1e   : > { %p450_p3 = pnand %p449_p2, %p443_p13 }
  0xaa   : > { %v233_v6 = vpop.xlane.xlu0 %232 }
  0xab   : > { %v234_v7 = vadd.f32 %v233_v6, %v221_v5 }
  0xad   : > { %vm235_vm2 = vcmp.eq.f32.partialorder %v234_v7, 0.0 }
  0xae   : > { %v236_v8 = vsel %vm235_vm2, -1e+20, %v234_v7 }
  0xaf   : > { %v238_v9 = vsel %vm237_vm1, %v236_v8, -inf }
  0xb0   : > { %v239_v10 = vrot.slane %v238_v9, 4 }
  0xb2   : > { %v240_v11 = vmax.f32 %v238_v9, %v239_v10 }
  0xb4   : > { %v241_v12 = vrot.slane %v240_v11, 2 }
  0xb6   : > { %v242_v13 = vmax.f32 %v240_v11, %v241_v12 }
  0xb8   : > { %v243_v14 = vrot.slane %v242_v13, 1 }
  0xba   : > { %v244_v15 = vmax.f32 %v242_v13, %v243_v14 }
  0xbc   : > { %v245_v16 = vsub.f32 %v236_v8, %v244_v15 }
  0xbe   : > { %v246_v17 = vmul.f32 1.442695, %v245_v16 }
  0xc0   : > { %436 = vpow2.f32 %v246_v17 }
  0xca   : > { %v437_v18 = vpop.eup %436 }
  0xcb   : > { %v248_v19 = vsel %vm237_vm1, %v437_v18, 0.0 }
  0xcc   : > { %v249_v20 = vrot.slane %v248_v19, 4 }
  0xce   : > { %v250_v21 = vadd.f32 %v249_v20, %v248_v19 }
  0xd0   : > { %v251_v22 = vrot.slane %v250_v21, 2 }
  0xd2   : > { %v252_v23 = vadd.f32 %v251_v22, %v250_v21 }
  0xd4   : > { %v253_v24 = vrot.slane %v252_v23, 1 }
  0xd6   : > { %v254_v25 = vadd.f32 %v253_v24, %v252_v23 }
  0xd8   : > { %438 = vrcp.f32 %v254_v25 }
  0xe2   : > { %v439_v26 = vpop.eup %438 }
  0xe3   : > { %v256_v27 = vmul.f32 %v439_v26, %v437_v18 }
  0xe5   : > { %260 = vperm.xlu0 %435, %v256_v27   ;;  %257 = vst.msk [vmem:[%s219_s13] sm:$0xff] %vm237_vm1, %v256_v27 }
 0x164   : > { %v261_v28 = vpop.permute.xlu0 %260 }
 0x165   : > { %v263_v29 = vmul.f32 %v261_v28, %v220_v1 }
 0x167   : > { %v264_v30 = vsel %vm230_vm0, %v263_v29, 0.0 }
 0x168   : > { %v265_v31 = vrot.slane %v264_v30, 4 }
 0x16a   : > { %v266_v32 = vadd.f32 %v265_v31, %v264_v30 }
 0x16c   : > { %v267_v33 = vrot.slane %v266_v32, 2 }
 0x16e   : > { %v268_v34 = vadd.f32 %v267_v33, %v266_v32 }
 0x170   : > { %v269_v35 = vrot.slane %v268_v34, 1 }
 0x172   : > { %v270_v36 = vadd.f32 %v269_v35, %v268_v34 }
 0x174   : > { %272 = vst.msk [vmem:[%s201_s22] sm:$0x1] %vm271_vm3, %v270_v36 }
 0x175   : > { %453 = shalt.err (!%p450_p3)
}
 0x176   : > { %s454_s8 = scalar_lea.hbm %s608_s29, 16  ;;  %s458_s11 = scalar_lea.hbm %s653_s3, 32 }
 0x177   : > { %p455_p4 = scmp.ne.s32.totalorder %s608_s29, %s454_s8  ;;  %p459_p9 = scmp.lt.u32.totalorder %s608_s29, %s653_s3 }
 0x178   : > { %p460_p10 = scmp.lt.u32.totalorder %s458_s11, %s454_s8  ;;  %p462_p12 = scmp.lt.u32.totalorder %s454_s8, %s608_s29 }
 0x179   : > { %p456_p7 = pnand %p455_p4, %p569_p5 }
 0x17a   : > { %p461_p11 = por %p460_p10, %p459_p9 }
 0x17b   : > { %p457_p8 = pneg %p456_p7 }
 0x17c   : > { %p463_p13 = por %p462_p12, %p461_p11 }
 0x17e   : > { %p464_p0 = pnand %p463_p13, %p457_p8 }
 0x180   : > { %467 = shalt.err (!%p464_p0)
}
 0x181   : > { %395 = dma.vmem_to_hbm [thread:$0]  (%p569_p5), %s610_s23, 16, %s608_s29, %s274_s30  }
 0x182 PF: > { %p401_p1 = scmp.ge.s32.totalorder %s502_s18, 2  ;;  %s305_s14 = sand.u32 1, %s490_s15  }
 0x183   : > { %s306_s20 = scalar_lea.sflag [#allocation3], %s305_s14 }
 0x184   : > { %p398_p2 = pnand %p401_p1, %p573_p6 }
 0x186   : > { %485 = dma.done.wait (!%p398_p2), %s306_s20, 16  }
 0x187   : > { %487 = vsyncadd (!%p398_p2), %s306_s20, 4294967280  ;;  %p15_p3 = scmp.ge.s32.totalorder %s556_s21, 4   ;;  %s657_s15 = smov %s494_s16 }
 0x188   : > { %s658_s16 = smov %s498_s17  ;;  %s659_s17 = smov %s567_s24 }
 0x189   : > { %s660_s18 = smov %s556_s21  ;;  %17 = sbr.rel (!%p15_p3) target bundleno = 3 (0x3), region = 82 }
 0x190   :  { %317 = vsyncpa [#allocation3], 1 }
 0x191   :  { %319 = vsyncpa [#allocation3 + $0x1], 1 }

</bundles_post_ra>
